<compile_context>
chip_gen: v5e
topology: v5e:2x2
jax: 0.10.0
libtpu: 0.0.40
codegen_flags: <defaults>
</compile_context>

<pallas_src>
import jax
import jax.numpy as jnp
from jax.experimental import pallas as pl
from jax.experimental.pallas import tpu as pltpu


def _make_split_kernel(chunk_starts, chunk_sizes):
    """Build a kernel that DMAs each contiguous chunk of the input straight
    into its own HBM output buffer (no VMEM round-trip)."""
    num_chunks = len(chunk_sizes)

    def kernel(x_hbm, *rest):
        out_refs = rest[:num_chunks]          # one HBM output ref per chunk
        sem = rest[num_chunks]                # DMA semaphores, shape (num_chunks,)
        copies = []
        # chunk_starts / chunk_sizes are static Python ints -> static slices,
        # each a single contiguous HBM window.
        for c in range(num_chunks):
            cp = pltpu.make_async_copy(
                x_hbm.at[pl.ds(chunk_starts[c], chunk_sizes[c])],
                out_refs[c],
                sem.at[c],
            )
            cp.start()                        # issue all DMAs first ...
            copies.append(cp)
        for cp in copies:                     # ... then wait (full overlap)
            cp.wait()

    return kernel


def sep_adapter_forward(image_embeds, n_frames):
    """Pallas implementation of SepAdapter.forward.

    image_embeds: (N, S, H) array.
    Returns: tuple of arrays; chunk c has shape
             (min(n_frames, N - c*n_frames), S, H),
             exactly matching torch.Tensor.split(n_frames) along dim 0.
    """
    N = image_embeds.shape[0]
    trailing = image_embeds.shape[1:]
    assert n_frames > 0

    chunk_starts, chunk_sizes = [], []
    off = 0
    while off < N:
        size = min(n_frames, N - off)          # ragged last chunk allowed
        chunk_starts.append(off)
        chunk_sizes.append(size)
        off += size
    num_chunks = len(chunk_sizes)

    out_shapes = tuple(
        jax.ShapeDtypeStruct((size,) + trailing, image_embeds.dtype)
        for size in chunk_sizes
    )

    outs = pl.pallas_call(
        _make_split_kernel(tuple(chunk_starts), tuple(chunk_sizes)),
        out_shape=out_shapes,
        # Raw HBM refs in and out: no auto-pipelining, no VMEM staging.
        in_specs=[pl.BlockSpec(memory_space=pl.ANY)],
        out_specs=tuple(
            pl.BlockSpec(memory_space=pl.ANY) for _ in range(num_chunks)
        ),
        scratch_shapes=[pltpu.SemaphoreType.DMA((num_chunks,))],
    )(image_embeds)

    if not isinstance(outs, (list, tuple)):
        outs = (outs,)
    return tuple(outs)


if __name__ == "__main__":
    # SepAdapter(num_features=1408) only stores hidden_size; it has no params.
    seq = 8            # tokens per frame
    hidden = 128       # small stand-in for 1408; kept a multiple of 128 (lane-dense)
    total_frames = 8

    key = jax.random.PRNGKey(0)
    image_embeds = jax.random.normal(
        key, (total_frames, seq, hidden), dtype=jnp.float32
    )

    # Test the equal-chunk split, a ragged-last-chunk split, and a single-chunk split.
    for n_frames in (4, 3, 16):
        out = sep_adapter_forward(image_embeds, n_frames)
        out = jax.block_until_ready(out)

        # Reference: plain slicing (== torch .split semantics).
        ref = tuple(
            image_embeds[s:s + min(n_frames, total_frames - s)]
            for s in range(0, total_frames, n_frames)
        )
        assert len(out) == len(ref)
        for o, r in zip(out, ref):
            assert o.shape == r.shape and o.dtype == r.dtype
            assert jnp.array_equal(o, r)

    print("KERNEL_OK")
</pallas_src>

<mosaic_0001>
module attributes {stable_mosaic.version = 11 : i64} {
  func.func @kernel(%arg0: memref<8x8x128xf32, #tpu.memory_space<any>>, %arg1: memref<4x8x128xf32, #tpu.memory_space<any>>, %arg2: memref<4x8x128xf32, #tpu.memory_space<any>>, %arg3: memref<2x!tpu.dma_semaphore, #tpu.memory_space<semaphore_mem>>) attributes {dimension_semantics = [], scalar_prefetch = 0 : i64, scratch_operands = 1 : i64, tpu.core_type = #tpu.core_type<tc>} {
    %c0_i32 = arith.constant 0 : i32
    %c0_i32_0 = arith.constant 0 : i32
    %c0_i32_1 = arith.constant 0 : i32
    %c0_i32_2 = arith.constant 0 : i32
    %0 = tpu.memref_slice %arg0[%c0_i32_0, %c0_i32_1, %c0_i32_2] : memref<8x8x128xf32, #tpu.memory_space<any>> -> memref<4x8x128xf32, #tpu.memory_space<any>>
    %1 = tpu.memref_slice %arg3[%c0_i32] : memref<2x!tpu.dma_semaphore, #tpu.memory_space<semaphore_mem>> -> memref<1x!tpu.dma_semaphore, #tpu.memory_space<semaphore_mem>>
    %2 = tpu.memref_squeeze %1 : memref<1x!tpu.dma_semaphore, #tpu.memory_space<semaphore_mem>> -> memref<!tpu.dma_semaphore, #tpu.memory_space<semaphore_mem>>
    tpu.enqueue_dma source(%0 : memref<4x8x128xf32, #tpu.memory_space<any>>) target(%arg1 : memref<4x8x128xf32, #tpu.memory_space<any>>) target_semaphore(%2 : memref<!tpu.dma_semaphore, #tpu.memory_space<semaphore_mem>>)
    %c1_i32 = arith.constant 1 : i32
    %c4_i32 = arith.constant 4 : i32
    %c0_i32_3 = arith.constant 0 : i32
    %c0_i32_4 = arith.constant 0 : i32
    %3 = tpu.memref_slice %arg0[%c4_i32, %c0_i32_3, %c0_i32_4] : memref<8x8x128xf32, #tpu.memory_space<any>> -> memref<4x8x128xf32, #tpu.memory_space<any>>
    %4 = tpu.memref_slice %arg3[%c1_i32] : memref<2x!tpu.dma_semaphore, #tpu.memory_space<semaphore_mem>> -> memref<1x!tpu.dma_semaphore, #tpu.memory_space<semaphore_mem>>
    %5 = tpu.memref_squeeze %4 : memref<1x!tpu.dma_semaphore, #tpu.memory_space<semaphore_mem>> -> memref<!tpu.dma_semaphore, #tpu.memory_space<semaphore_mem>>
    tpu.enqueue_dma source(%3 : memref<4x8x128xf32, #tpu.memory_space<any>>) target(%arg2 : memref<4x8x128xf32, #tpu.memory_space<any>>) target_semaphore(%5 : memref<!tpu.dma_semaphore, #tpu.memory_space<semaphore_mem>>)
    %c0_i32_5 = arith.constant 0 : i32
    %c0_i32_6 = arith.constant 0 : i32
    %c0_i32_7 = arith.constant 0 : i32
    %c0_i32_8 = arith.constant 0 : i32
    %6 = tpu.memref_slice %arg0[%c0_i32_6, %c0_i32_7, %c0_i32_8] : memref<8x8x128xf32, #tpu.memory_space<any>> -> memref<4x8x128xf32, #tpu.memory_space<any>>
    %7 = tpu.memref_slice %arg3[%c0_i32_5] : memref<2x!tpu.dma_semaphore, #tpu.memory_space<semaphore_mem>> -> memref<1x!tpu.dma_semaphore, #tpu.memory_space<semaphore_mem>>
    %8 = tpu.memref_squeeze %7 : memref<1x!tpu.dma_semaphore, #tpu.memory_space<semaphore_mem>> -> memref<!tpu.dma_semaphore, #tpu.memory_space<semaphore_mem>>
    tpu.wait_dma2 semaphore(%8 : memref<!tpu.dma_semaphore, #tpu.memory_space<semaphore_mem>>) src(%6 : memref<4x8x128xf32, #tpu.memory_space<any>>) dst(%arg1 : memref<4x8x128xf32, #tpu.memory_space<any>>)
    %c1_i32_9 = arith.constant 1 : i32
    %c4_i32_10 = arith.constant 4 : i32
    %c0_i32_11 = arith.constant 0 : i32
    %c0_i32_12 = arith.constant 0 : i32
    %9 = tpu.memref_slice %arg0[%c4_i32_10, %c0_i32_11, %c0_i32_12] : memref<8x8x128xf32, #tpu.memory_space<any>> -> memref<4x8x128xf32, #tpu.memory_space<any>>
    %10 = tpu.memref_slice %arg3[%c1_i32_9] : memref<2x!tpu.dma_semaphore, #tpu.memory_space<semaphore_mem>> -> memref<1x!tpu.dma_semaphore, #tpu.memory_space<semaphore_mem>>
    %11 = tpu.memref_squeeze %10 : memref<1x!tpu.dma_semaphore, #tpu.memory_space<semaphore_mem>> -> memref<!tpu.dma_semaphore, #tpu.memory_space<semaphore_mem>>
    tpu.wait_dma2 semaphore(%11 : memref<!tpu.dma_semaphore, #tpu.memory_space<semaphore_mem>>) src(%9 : memref<4x8x128xf32, #tpu.memory_space<any>>) dst(%arg2 : memref<4x8x128xf32, #tpu.memory_space<any>>)
    return
  }
}

</mosaic_0001>

<bundles_post_ra>
// kernel: tpu_custom_call.1
= control target key start
LH: loop header
LB: loop body
LE: loop exit
PB: predicated region body
PF: predicated region fallthrough
CT: control target
= control target key end

     0   :  { %s62_s18 = smov [#allocation2]   ;;  %s63_s19 = smov [#allocation3]   ;;  %s94_s0 = inlined_call_operand.hbm [shape: f32[8,8,128], index: 0, kind: input, shape index: {}]   ;;  %s95_s1 = inlined_call_operand.hbm [shape: f32[4,8,128], index: 1, kind: output, shape index: {0}]   ;;  %s96_s2 = inlined_call_operand.hbm [shape: f32[4,8,128], index: 2, kind: output, shape index: {1}]  }
   0x1   :  { %s12_s11 = sshll.u32 %s94_s0, 4  ;;  %s14_s14 = sshll.u32 %s95_s1, 4  ;;  %s13_s11 = int_to_ptr.hbm [resolvable:$true] %s12_s11  ;;  %s15_s14 = int_to_ptr.hbm [resolvable:$true] %s14_s14 }
   0x2   :  { %s19_s17 = scalar_lea.hbm %s94_s0, 32  ;;  %s64_s20 = smov 0  }
   0x3   :  { %18 = dma.general %s13_s11, 512, %s15_s14, %s62_s18, %s63_s19, [#allocation4], %s64_s20, 0  }
   0x4   :  { %s25_s21 = sshll.u32 %s19_s17, 4  ;;  %s27_s24 = sshll.u32 %s96_s2, 4  ;;  %s26_s21 = int_to_ptr.hbm [resolvable:$true] %s25_s21  ;;  %s28_s24 = int_to_ptr.hbm [resolvable:$true] %s27_s24 }
   0x5   :  { %s65_s25 = smov [#allocation2 + $0x1]   ;;  %s66_s26 = smov [#allocation5]  }
   0x6   :  { %31 = dma.general %s26_s21, 512, %s28_s24, %s65_s25, %s66_s26, [#allocation6], %s64_s20, 0  }
   0x7   :  { %58 = dma.done.wait [#allocation2], 512 }
   0x8   :  { %59 = vsyncadd [#allocation2], 4294966784 }
   0x9   :  { %60 = dma.done.wait [#allocation2 + $0x1], 512 }
   0xa   :  { %61 = vsyncadd [#allocation2 + $0x1], 4294966784 }
   0xb   :  { %38 = vsyncmov [#allocation2] }
   0xe   :  { %s39_s0 = vpop.sfrf %38 }
   0xf   :  { %p51_p0 = scmp.ne.s32.totalorder %s39_s0, 0 }
  0x11   :  { %43 = shalt.err (%p51_p0)  }
  0x12   :  { %45 = vsyncmov [#allocation2 + $0x1] }
  0x15   :  { %s46_s1 = vpop.sfrf %45 }
  0x16   :  { %p52_p1 = scmp.ne.s32.totalorder %s46_s1, 0 }
  0x18   :  { %50 = shalt.err (%p52_p1)  }

</bundles_post_ra>
